<compile_context>
chip_gen: v6e
topology: v6e:2x2x1
jax: 0.10.0
libtpu: 0.0.40
codegen_flags: <defaults>
</compile_context>

<pallas_src>
import jax
import jax.numpy as jnp
from jax.experimental import pallas as pl
from jax.experimental.pallas import tpu as pltpu


def _block_kernel(x_ref, w_ref, shift_ref, o_ref):
    # x_ref:     (C_in, tn)   tile of the (B, C_in, HW) activations (batch squeezed)
    # w_ref:     (C_out, C_in) 1x1-conv weight with BN scale folded in
    # shift_ref: (C_out, 1)    folded BN shift = beta - mean * scale
    # o_ref:     (C_out, tn)
    y = jnp.dot(w_ref[...], x_ref[...], preferred_element_type=jnp.float32)
    o_ref[...] = jnp.maximum(y + shift_ref[...], 0.0)


def _pick_hw_tile(hw, max_tile):
    """Pick a lane-dense HW tile: full extent if it fits, else the largest
    multiple of 128 (preferring one that divides hw so no partial block)."""
    if hw <= max_tile:
        return hw                      # full array dim: always a legal block dim
    max_tile = max(128, (max_tile // 128) * 128)
    for t in range(max_tile, 127, -128):
        if hw % t == 0:
            return t
    return max_tile                    # partial last block; Pallas masks OOB writes


def basic_block_2d(features, conv_weight, bn_gamma, bn_beta,
                   bn_mean, bn_var, eps=1e-5, max_hw_tile=2048):
    """features: (B, C_in, H, W) NCHW float32
       conv_weight: (C_out, C_in, 1, 1) as in nn.Conv2d (bias=False)
       returns: (B, C_out, H, W) float32"""
    B, C_in, H, W = features.shape
    C_out = conv_weight.shape[0]
    HW = H * W

    # Fold BN (eval mode) into scale/shift, then fold scale into the conv weight.
    scale = bn_gamma / jnp.sqrt(bn_var + eps)                       # (C_out,)
    shift = bn_beta - bn_mean * scale                               # (C_out,)
    w = conv_weight.reshape(C_out, C_in).astype(jnp.float32) * scale[:, None]
    shift2d = shift.reshape(C_out, 1).astype(jnp.float32)

    # NCHW view (free reshape, no transpose, no pad).
    x = features.reshape(B, C_in, HW).astype(jnp.float32)

    # Cap the tile so double-buffered x + out tiles stay ~<= 8 MiB (safe for
    # the 16 MiB scoped default on v5e; v6e/v7x have >= 32 MiB scoped).
    bytes_per_col = 4 * (C_in + C_out)
    vmem_cap_cols = max(128, (8 * 1024 * 1024) // (2 * bytes_per_col))
    tn = _pick_hw_tile(HW, min(max_hw_tile, vmem_cap_cols))

    grid = (B, pl.cdiv(HW, tn))

    out = pl.pallas_call(
        _block_kernel,
        out_shape=jax.ShapeDtypeStruct((B, C_out, HW), jnp.float32),
        grid_spec=pltpu.PrefetchScalarGridSpec(
            num_scalar_prefetch=0,
            grid=grid,
            in_specs=[
                pl.BlockSpec((pl.Squeezed(), C_in, tn), lambda b, j: (b, 0, j)),
                pl.BlockSpec((C_out, C_in), lambda b, j: (0, 0)),
                pl.BlockSpec((C_out, 1), lambda b, j: (0, 0)),
            ],
            out_specs=pl.BlockSpec((pl.Squeezed(), C_out, tn),
                                   lambda b, j: (b, 0, j)),
        ),
        compiler_params=pltpu.CompilerParams(
            dimension_semantics=("parallel", "parallel")),
    )(x, w, shift2d)

    return out.reshape(B, C_out, H, W)


if __name__ == "__main__":
    key = jax.random.PRNGKey(0)
    B, C_in, C_out, Hs, Ws = 2, 4, 8, 16, 16

    k1, k2, k3, k4, k5, k6 = jax.random.split(key, 6)
    features = jax.random.normal(k1, (B, C_in, Hs, Ws), dtype=jnp.float32)
    conv_weight = jax.random.normal(k2, (C_out, C_in, 1, 1), dtype=jnp.float32) * 0.1
    bn_gamma = jax.random.normal(k3, (C_out,), dtype=jnp.float32) * 0.1 + 1.0
    bn_beta = jax.random.normal(k4, (C_out,), dtype=jnp.float32) * 0.1
    bn_mean = jax.random.normal(k5, (C_out,), dtype=jnp.float32) * 0.1
    bn_var = jax.nn.softplus(jax.random.normal(k6, (C_out,), dtype=jnp.float32)) + 0.5

    out = basic_block_2d(features, conv_weight, bn_gamma, bn_beta, bn_mean, bn_var)
    out = jax.block_until_ready(out)

    # Pure-JAX reference (1x1 conv == channel matmul, BN eval, ReLU).
    w_ref = conv_weight.reshape(C_out, C_in)
    y_ref = jnp.einsum("oc,bchw->bohw", w_ref, features)
    scale = bn_gamma / jnp.sqrt(bn_var + 1e-5)
    shift = bn_beta - bn_mean * scale
    y_ref = y_ref * scale[None, :, None, None] + shift[None, :, None, None]
    y_ref = jnp.maximum(y_ref, 0.0)

    assert out.shape == (B, C_out, Hs, Ws)
    assert jnp.allclose(out, y_ref, atol=1e-4, rtol=1e-4)

    print("KERNEL_OK")
</pallas_src>

<mosaic_0001>
module attributes {stable_mosaic.version = 11 : i64} {
  func.func @_block_kernel(%arg0: i32, %arg1: i32, %arg2: memref<1x4x256xf32, #tpu.memory_space<vmem>>, %arg3: memref<8x4xf32, #tpu.memory_space<vmem>>, %arg4: memref<8x1xf32, #tpu.memory_space<vmem>>, %arg5: memref<1x8x256xf32, #tpu.memory_space<vmem>>) attributes {dimension_semantics = [#tpu.dimension_semantics<parallel>, #tpu.dimension_semantics<parallel>], iteration_bounds = array<i64: 2, 1>, scalar_prefetch = 0 : i64, scratch_operands = 0 : i64, tpu.core_type = #tpu.core_type<tc>, window_params = [{transform_indices = @transform_0, window_bounds = array<i64: 1, 4, 256>}, {pipeline_mode = #tpu.pipeline_mode<synchronous>, transform_indices = @transform_1, window_bounds = array<i64: 8, 4>}, {pipeline_mode = #tpu.pipeline_mode<synchronous>, transform_indices = @transform_2, window_bounds = array<i64: 8, 1>}, {transform_indices = @transform_3, window_bounds = array<i64: 1, 8, 256>}]} {
    %c0 = arith.constant 0 : index
    %c0_0 = arith.constant 0 : index
    %0 = vector.load %arg3[%c0, %c0_0] : memref<8x4xf32, #tpu.memory_space<vmem>>, vector<8x4xf32>
    %c0_1 = arith.constant 0 : index
    %c0_2 = arith.constant 0 : index
    %c0_3 = arith.constant 0 : index
    %1 = vector.load %arg2[%c0_1, %c0_2, %c0_3] : memref<1x4x256xf32, #tpu.memory_space<vmem>>, vector<1x4x256xf32>
    %2 = vector.shape_cast %1 : vector<1x4x256xf32> to vector<4x256xf32>
    %cst = arith.constant dense<0.000000e+00> : vector<8x256xf32>
    %3 = tpu.matmul %0, %2, %cst {dimension_numbers = #tpu.dot_dimension_numbers<[1], [0], [0], [1], [0, 0, 1, 1], [], []>} : vector<8x4xf32>, vector<4x256xf32>, vector<8x256xf32> -> vector<8x256xf32>
    %c0_4 = arith.constant 0 : index
    %c0_5 = arith.constant 0 : index
    %4 = vector.load %arg4[%c0_4, %c0_5] : memref<8x1xf32, #tpu.memory_space<vmem>>, vector<8x1xf32>
    %5 = vector.broadcast %4 : vector<8x1xf32> to vector<8x256xf32>
    %6 = arith.addf %3, %5 : vector<8x256xf32>
    %cst_6 = arith.constant 0.000000e+00 : f32
    %7 = vector.broadcast %cst_6 : f32 to vector<8x256xf32>
    %8 = arith.maximumf %6, %7 : vector<8x256xf32>
    %c0_7 = arith.constant 0 : index
    %c0_8 = arith.constant 0 : index
    %c0_9 = arith.constant 0 : index
    %9 = vector.load %arg5[%c0_7, %c0_8, %c0_9] : memref<1x8x256xf32, #tpu.memory_space<vmem>>, vector<1x8x256xf32>
    %10 = vector.shape_cast %9 : vector<1x8x256xf32> to vector<8x256xf32>
    %11 = vector.shape_cast %8 : vector<8x256xf32> to vector<1x8x256xf32>
    tpu.vector_store %arg5[%c0_7, %c0_8, %c0_9], %11 {strides = array<i32>} : memref<1x8x256xf32, #tpu.memory_space<vmem>>, vector<1x8x256xf32>,
    return
  }
  func.func @transform_0(%arg0: i32, %arg1: i32) -> (i32, i32, i32) {
    %c0_i32 = arith.constant 0 : i32
    %c0_i32_0 = arith.constant 0 : i32
    return %arg0, %c0_i32, %arg1 : i32, i32, i32
  }
  func.func @transform_1(%arg0: i32, %arg1: i32) -> (i32, i32) {
    %c0_i32 = arith.constant 0 : i32
    %c0_i32_0 = arith.constant 0 : i32
    %c0_i32_1 = arith.constant 0 : i32
    return %c0_i32, %c0_i32_0 : i32, i32
  }
  func.func @transform_2(%arg0: i32, %arg1: i32) -> (i32, i32) {
    %c0_i32 = arith.constant 0 : i32
    %c0_i32_0 = arith.constant 0 : i32
    %c0_i32_1 = arith.constant 0 : i32
    return %c0_i32, %c0_i32_0 : i32, i32
  }
  func.func @transform_3(%arg0: i32, %arg1: i32) -> (i32, i32, i32) {
    %c0_i32 = arith.constant 0 : i32
    %c0_i32_0 = arith.constant 0 : i32
    return %arg0, %c0_i32, %arg1 : i32, i32, i32
  }
}

</mosaic_0001>

<bundles_post_ra>
// kernel: tpu_custom_call.1
= control target key start
LH: loop header
LB: loop body
LE: loop exit
PB: predicated region body
PF: predicated region fallthrough
CT: control target
= control target key end

     0   :  { %8 = vsyncpa [#allocation3], 0  ;;  %s670_s0 = inlined_call_operand.vmem [shape: f32[2,4,256], index: 0, kind: input, shape index: {}]   ;;  %s671_s1 = inlined_call_operand.vmem [shape: f32[8,4], index: 1, kind: input, shape index: {}]   ;;  %s672_s2 = inlined_call_operand.vmem [shape: f32[8,1], index: 2, kind: input, shape index: {}]   ;;  %s673_s3 = inlined_call_operand.hbm [shape: f32[2,8,256], index: 3, kind: output, shape index: {}]  }
   0x1   :  { %10 = vsyncpa [#allocation3 + $0x1], 0  ;;  %s565_s12 = smov 0   ;;  %s567_s13 = smov 0  }
   0x2   :  { %s569_s14 = smov 0   ;;  %s571_s15 = smov 0  }
   0x3   :  { %s573_s16 = smov 0   ;;  %s575_s17 = smov 0  }
   0x4 LB: > { %s387_s18 = sadd.s32 4294967295, %s540_s17   ;;  %s388_s19 = sadd.s32 4294967294, %s540_s17   ;;  %s540_s17 = sphi %s575_s17, %s16_s17   ;;  %s536_s16 = sphi %s573_s16, %s680_s16   ;;  %s532_s15 = sphi %s571_s15, %s679_s15   ;;  %s528_s14 = sphi %s569_s14, %s678_s14   ;;  %s524_s13 = sphi %s567_s13, %s677_s13   ;;  %s520_s12 = sphi %s565_s12, %s676_s12  }
   0x5   : > { %s28_s20 = sadd.s32 1, %s536_s16  ;;  %s107_s21 = sadd.s32 1, %s528_s14 }
   0x6   : > { %p30_p0 = scmp.ge.s32.totalorder %s28_s20, 2  ;;  %p117_p1 = scmp.ne.s32.totalorder %s528_s14, %s524_s13 }
   0x7   : > { %p118_p2 = scmp.eq.s32.totalorder %s387_s18, 1  ;;  %p123_p3 = scmp.ne.s32.totalorder %s524_s13, %s520_s12 }
   0x8   : > { %s682_s20 = smov (%p30_p0, %s28_s20), 0  ;;  %p124_p5 = scmp.eq.s32.totalorder %s388_s19, 1 }
   0x9   : > { %p605_p4 = por %p118_p2, %p117_p1  ;;  %s102_s23 = ssub.s32 %s536_s16, %s682_s20 }
   0xa   : > { %p391_p6 = scmp.ge.s32.totalorder %s540_s17, 1  ;;  %p105_p7 = scmp.eq.s32.totalorder %s102_s23, 0 }
   0xb   : > { %p612_p8 = por %p124_p5, %p123_p3  ;;  %p161_p9 = scmp.lt.s32.totalorder %s540_s17, 3 }
   0xc   : > { %s618_s25 = scalar_select %p105_p7, %s528_s14, %s107_s21  }
   0xd   : > { %p162_p10 = pnand %p391_p6, %p161_p9 }
   0xe   : > { %p190_p11 = scmp.lt.s32.totalorder (!%p162_p10), %s532_s15, 1  ;;  %s186_s8 = sand.u32 (!%p162_p10), 1, %s524_s13  }
   0xf   : > { %165 = sbr.rel (%p162_p10) target bundleno = 241 (0xf1), region = 32  ;;  %s392_s9 = sshll.u32 (!%p162_p10), %s186_s8, 4 }
  0x10   : > { %s404_s10 = sshll.u32 (!%p162_p10), %s532_s15, 8  ;;  %s188_s11 = scalar_lea.vmem (!%p162_p10), [#allocation2], %s392_s9 }
  0x11   : > { %s311_s18 = sshll.u32 (!%p162_p10), %s188_s11, 4  ;;  %s309_s23 = scalar_lea.hbm (!%p162_p10), %s673_s3, %s404_s10  ;;  %s312_s18 = int_to_ptr.vmem [resolvable:$true] %s311_s18 }
  0x12   : > { %s295_s26 = scalar_lea.sflag (!%p162_p10), [#allocation3], %s186_s8  ;;  %s464_s27 = scalar_lea.vmem (!%p162_p10), %s312_s18, 256 }
  0x13   : > { %p465_p12 = scmp.ne.s32.totalorder (!%p162_p10), %s312_s18, %s464_s27 }
  0x14   : > { %v542_v0 = vmov 0.0   ;;  %v543_v1 = vmov 0   ;;  %v202_v2 = vld [vmem:[%s672_s2] sm:$0xff]  ;;  %s191_s28 = scalar_select %p190_p11, %s532_s15, 1  ;;  %vm214_vm0 = vcmask 1043456   ;;  %vm210_vm1 = vcmask 31744  }
  0x15   : > { %283 = vmatprep.mubr.f32.mxu0 %v542_v0  ;;  %462 = vset.pattern.permute.xlu0 %v543_v1  ;;  %v200_v5 = vld [vmem:[%s671_s1] sm:$0xff]  ;;  %p466_p13 = pnand %p465_p12, %p605_p4 }
  0x16   : > { %205 = vperm.xlu0 %462, %v202_v2   ;;  %s403_s29 = sshll.u32 %s191_s28, 3  ;;  %s544_s28 = smov [#allocation2]  }
  0x17   : > { %s197_s5 = scalar_lea.vmem %s670_s0, %s403_s29  ;;  %p467_p0 = pneg %p466_p13 }
  0x18   : > { %v201_v3 = vld [vmem:[%s197_s5] sm:$0xff]  ;;  %s468_s15 = sshll.u32 %s544_s28, 4  ;;  %s469_s15 = int_to_ptr.vmem [resolvable:$false] %s468_s15 }
  0x19   : > { %v209_v4 = vcombine.high %v201_v3, %v201_v3  ;;  %s470_s29 = scalar_lea.vmem %s469_s15, 512  ;;  %p471_p1 = scmp.lt.s32.totalorder %s312_s18, %s469_s15 }
  0x1a   : > { %p472_p2 = scmp.lt.s32.totalorder %s470_s29, %s464_s27 }
  0x1b   : > { %395 = vmatprep.subr.msk.mxu0 %vm214_vm0, %v209_v4 }
  0x1c   : > { %396 = vmatpush1.msk.msra.mxu0 %vm214_vm0, %v201_v3  ;;  %p473_p3 = por %p472_p2, %p471_p1 }
  0x1d   : > { %397 = vmatmul.mubr.msk.f32.vlgmr.msra.gmra.mxu0 %vm210_vm1, %v200_v5 }
  0x1e   : > { %p474_p5 = pnand %p473_p3, %p467_p0 }
  0x91   : > { %v206_v6 = vpop.permute.xlu0 %205 }
  0xdd   : > { %v285_v7 = vpop.f32.mrf.mxu0 }
  0xde   : > { %v286_v8 = vadd.f32 %v285_v7, %v206_v6 }
  0xdf   : > { %v287_v9 = vpop.f32.mrf.mxu0 }
  0xe0   : > { %v290_v10 = vmax.f32 %v286_v8, 0.0  ;;  %v288_v11 = vadd.f32 %v287_v9, %v206_v6 }
  0xe2   : > { %292 = vst [vmem:[%s188_s11] sm:$0xff] %v290_v10  ;;  %v291_v12 = vmax.f32 %v288_v11, 0.0 }
  0xe4   : > { %293 = vst [vmem:[%s188_s11 + $0x8] sm:$0xff] %v291_v12 }
  0xe5   : > { %477 = shalt.err (!%p474_p5)
}
  0xe6   : > { %s478_s30 = scalar_lea.hbm %s309_s23, 256  ;;  %s482_s6 = scalar_lea.hbm %s673_s3, 512 }
  0xe7   : > { %p479_p6 = scmp.ne.s32.totalorder %s309_s23, %s478_s30  ;;  %p483_p10 = scmp.lt.s32.totalorder %s309_s23, %s673_s3 }
  0xe8   : > { %p484_p11 = scmp.lt.s32.totalorder %s482_s6, %s478_s30 }
  0xe9   : > { %p480_p7 = pnand %p479_p6, %p605_p4 }
  0xea   : > { %p485_p12 = por %p484_p11, %p483_p10 }
  0xeb   : > { %p481_p9 = pneg %p480_p7 }
  0xed   : > { %p486_p13 = pnand %p485_p12, %p481_p9 }
  0xef   : > { %489 = shalt.err (!%p486_p13)
}
  0xf0   : > { %405 = dma.vmem_to_hbm [thread:$0]  (%p605_p4), %s312_s18, 256, %s309_s23, %s295_s26  }
  0xf1 PF: > { %p411_p0 = scmp.ge.s32.totalorder %s540_s17, 2  ;;  %s323_s9 = sand.u32 1, %s520_s12  }
  0xf2   : > { %s324_s10 = scalar_lea.sflag [#allocation3], %s323_s9 }
  0xf3   : > { %p408_p1 = pnand %p411_p0, %p612_p8 }
  0xf5   : > { %p409_p2 = pneg %p408_p1 }
  0xf7   : > { %515 = dma.done.wait (%p409_p2), %s324_s10, 256  }
  0xf8   : > { %517 = vsyncadd (%p409_p2), %s324_s10, 4294967040  ;;  %s16_s17 = sadd.s32 1, %s540_s17   ;;  %s676_s12 = smov %s524_s13 }
  0xf9   : > { %p13_p3 = scmp.ge.s32.totalorder %s16_s17, 4   ;;  %s677_s13 = smov %s528_s14 }
  0xfa   : > { %s678_s14 = smov %s618_s25  ;;  %s679_s15 = smov %s536_s16 }
  0xfb   : > { %s680_s16 = smov %s682_s20  ;;  %15 = sbr.rel (!%p13_p3) target bundleno = 4 (0x4), region = 67 }
 0x100   :  { %329 = vsyncpa [#allocation3], 1 }
 0x101   :  { %331 = vsyncpa [#allocation3 + $0x1], 1 }

</bundles_post_ra>
